<compile_context>
chip_gen: v7x
topology: tpu7x:2x2x1
jax: 0.10.0
libtpu: 0.0.40
codegen_flags: <defaults>
</compile_context>

<pallas_src>
import functools
import math

import jax
import jax.numpy as jnp
from jax.experimental import pallas as pl
from jax.experimental.pallas import tpu as pltpu


def _pick_tile(n, target):
    """Largest divisor of n that is <= target (n itself if n <= target)."""
    t = min(n, max(1, target))
    while n % t:
        t -= 1
    return t


# ----------------------------------------------------------------------------
# Kernel A: tiled GEMM + folded-BN bias + activation  (all 1x1 convs, stem GEMM)
# ----------------------------------------------------------------------------

def _gemm_k1_kernel(a_ref, w_ref, b_ref, o_ref, *, act):
    x = jnp.dot(a_ref[...], w_ref[...], preferred_element_type=jnp.float32)
    x = x + b_ref[...]
    if act == "relu":
        x = jnp.maximum(x, 0.0)
    elif act == "sigmoid":
        x = jax.nn.sigmoid(x)
    o_ref[...] = x.astype(o_ref.dtype)


def _gemm_acc_kernel(a_ref, w_ref, b_ref, o_ref, acc_ref, *, act, nk):
    @pl.when(pl.program_id(2) == 0)
    def _init():
        acc_ref[...] = jnp.zeros_like(acc_ref)

    acc_ref[...] += jnp.dot(a_ref[...], w_ref[...],
                            preferred_element_type=jnp.float32)

    @pl.when(pl.program_id(2) == nk - 1)
    def _finalize():
        x = acc_ref[...] + b_ref[...]
        if act == "relu":
            x = jnp.maximum(x, 0.0)
        elif act == "sigmoid":
            x = jax.nn.sigmoid(x)
        o_ref[...] = x.astype(o_ref.dtype)


def gemm_bias_act(a, w, b, act="none", out_dtype=jnp.bfloat16):
    """act(a @ w + b).  a:(M,K)  w:(K,N) bf16  b:(1,N) f32  -> (M,N)."""
    M, K = a.shape
    N = w.shape[-1]
    if M >= 256:
        TM = 256
        Mp = -(-M // TM) * TM
    else:
        TM, Mp = M, M
    if Mp != M:
        a = jnp.pad(a, ((0, Mp - M), (0, 0)))
    TN = _pick_tile(N, 512)
    nm, nn = Mp // TM, N // TN
    a = a.astype(jnp.bfloat16)

    if K <= 1024:
        # Weight fits comfortably in VMEM per N tile: no K split, no accumulator.
        out = pl.pallas_call(
            functools.partial(_gemm_k1_kernel, act=act),
            grid=(nm, nn),
            in_specs=[
                pl.BlockSpec((TM, K), lambda i, j: (i, 0)),
                pl.BlockSpec((K, TN), lambda i, j: (0, j)),
                pl.BlockSpec((1, TN), lambda i, j: (0, j)),
            ],
            out_specs=pl.BlockSpec((TM, TN), lambda i, j: (i, j)),
            out_shape=jax.ShapeDtypeStruct((Mp, N), out_dtype),
            compiler_params=pltpu.CompilerParams(
                dimension_semantics=("parallel", "parallel")),
        )(a, w, b)
    else:
        TK = _pick_tile(K, 512)
        nk = K // TK
        out = pl.pallas_call(
            functools.partial(_gemm_acc_kernel, act=act, nk=nk),
            grid=(nm, nn, nk),
            in_specs=[
                pl.BlockSpec((TM, TK), lambda i, j, k: (i, k)),
                pl.BlockSpec((TK, TN), lambda i, j, k: (k, j)),
                pl.BlockSpec((1, TN), lambda i, j, k: (0, j)),
            ],
            out_specs=pl.BlockSpec((TM, TN), lambda i, j, k: (i, j)),
            out_shape=jax.ShapeDtypeStruct((Mp, N), out_dtype),
            scratch_shapes=[pltpu.VMEM((TM, TN), jnp.float32)],
            compiler_params=pltpu.CompilerParams(
                dimension_semantics=("parallel", "parallel", "arbitrary")),
        )(a, w, b)
    return out if Mp == M else out[:M]


def conv1x1_bn_act(x, p, act, stride=1):
    """1x1 Conv(bias=False) + folded eval-BN + activation, NHWC, no im2col."""
    if stride > 1:
        x = x[:, ::stride, ::stride, :]
    B, H, W, C = x.shape
    y = gemm_bias_act(x.reshape(B * H * W, C), p["w"], p["b"], act)
    return y.reshape(B, H, W, p["cout"])


# ----------------------------------------------------------------------------
# Kernel B: grouped 3x3 conv via tap-accumulation on stride-phase slabs
# ----------------------------------------------------------------------------

def _gconv_kernel(*refs, nphase, kh, kw, stride, th, wo, act):
    """One super-group of a grouped 3x3 conv.  The padded image (pre-split into
    stride phases so window extraction is unit stride) stays VMEM-resident; each
    of the kh*kw taps does a (rows, cin_sg) @ (cin_sg, cout_sg) matmul into one
    f32 accumulator (no in-kernel im2col concat).  Output tile is lane-dense."""
    phase_refs = refs[:nphase]
    w_ref, b_ref, o_ref = refs[nphase:]
    s = stride
    slab_h = th + (kh - 1) // s
    ho0 = pl.multiple_of(pl.program_id(1) * th, th)
    slabs = [pr[0, pl.ds(ho0, slab_h), :, :] for pr in phase_refs]
    rows = th * wo
    cin_sg = slabs[0].shape[-1]
    cout_sg = w_ref.shape[-1]

    acc = jnp.zeros((rows, cout_sg), jnp.float32)
    for dh in range(kh):
        for dw in range(kw):
            sl = slabs[(dh % s) * s + (dw % s)]
            win = sl[dh // s:dh // s + th, dw // s:dw // s + wo, :]
            acc = acc + jnp.dot(win.reshape(rows, cin_sg),
                                w_ref[dh * kw + dw],
                                preferred_element_type=jnp.float32)

    acc = acc + b_ref[...]
    if act == "relu":
        acc = jnp.maximum(acc, 0.0)
    o_ref[...] = acc[None].astype(o_ref.dtype)


def conv3x3_grouped_bn_act(x, p, stride, padding, act="relu"):
    """Cardinality-32 3x3 conv + folded eval-BN + activation, NHWC."""
    B, H, W, C = x.shape
    kh, kw = p["kh"], p["kw"]
    s = stride
    Ho = (H + 2 * padding - kh) // s + 1
    Wo = (W + 2 * padding - kw) // s + 1
    ph_h = Ho + (kh - 1) // s
    ph_w = Wo + (kw - 1) // s
    pad_h = ph_h * s - H - padding
    pad_w = ph_w * s - W - padding
    xp = jnp.pad(x.astype(jnp.bfloat16),
                 ((0, 0), (padding, pad_h), (padding, pad_w), (0, 0)))
    # Split the padded image into s*s stride phases so the kernel only does
    # unit-stride window extraction (cost: one small relayout, not a 9x im2col).
    phases = [xp[:, ih::s, iw::s, :][:, :ph_h, :ph_w, :]
              for ih in range(s) for iw in range(s)]
    nph = s * s

    th = _pick_tile(Ho, max(1, 128 // Wo))
    n_sg = p["n_sg"]
    cin_sg, cout_sg, cout = p["cin_sg"], p["cout_sg"], p["cout"]
    grid = (B, Ho // th, n_sg)

    phase_spec = pl.BlockSpec((1, ph_h, ph_w, cin_sg),
                              lambda b, t, g: (b, 0, 0, g))
    out = pl.pallas_call(
        functools.partial(_gconv_kernel, nphase=nph, kh=kh, kw=kw, stride=s,
                          th=th, wo=Wo, act=act),
        grid=grid,
        in_specs=[phase_spec] * nph + [
            pl.BlockSpec((kh * kw, cin_sg, cout_sg), lambda b, t, g: (g, 0, 0)),
            pl.BlockSpec((1, cout_sg), lambda b, t, g: (0, g)),
        ],
        out_specs=pl.BlockSpec((1, th * Wo, cout_sg), lambda b, t, g: (b, t, g)),
        out_shape=jax.ShapeDtypeStruct((B, Ho * Wo, cout), jnp.bfloat16),
        compiler_params=pltpu.CompilerParams(
            dimension_semantics=("parallel", "parallel", "parallel")),
    )(*phases, p["w"], p["b"])
    return out.reshape(B, Ho, Wo, cout)


# ----------------------------------------------------------------------------
# Stem: 7x7/stride-2 conv.  cin=3 is a pathological lane layout for in-kernel
# patch building, so im2col happens in XLA (~0.6 MB at 64x64) + Pallas GEMM.
# ----------------------------------------------------------------------------

def stem_conv_bn_relu(x, p):
    # TODO(synk): stem patches are materialized by XLA; negligible at this size.
    B, H, W, C = x.shape
    kh, kw, s, pad = p["kh"], p["kw"], 2, 3
    Ho = (H + 2 * pad - kh) // s + 1
    Wo = (W + 2 * pad - kw) // s + 1
    xp = jnp.pad(x.astype(jnp.bfloat16),
                 ((0, 0), (pad, pad), (pad, pad), (0, 0)))
    cols = [xp[:, dh:dh + (Ho - 1) * s + 1:s, dw:dw + (Wo - 1) * s + 1:s, :]
            for dh in range(kh) for dw in range(kw)]
    patches = jnp.concatenate(cols, axis=-1).reshape(B * Ho * Wo, kh * kw * C)
    y = gemm_bias_act(patches, p["w"], p["b"], act="relu")
    return y.reshape(B, Ho, Wo, p["cout"])


# ----------------------------------------------------------------------------
# Kernel C: fused SE gate (GAP + fc1/relu + fc2/sigmoid) + scale + residual + relu
# ----------------------------------------------------------------------------

def _se_scale_add_relu_kernel(x_ref, r_ref, w1_ref, b1_ref, w2_ref, b2_ref,
                              o_ref, *, inv_hw):
    x = x_ref[...].astype(jnp.float32)                       # (1, HW, C)
    pooled = jnp.sum(x, axis=1) * inv_hw                     # (1, C)
    z = jnp.dot(pooled.astype(jnp.bfloat16), w1_ref[...],
                preferred_element_type=jnp.float32) + b1_ref[...]
    z = jnp.maximum(z, 0.0)
    g = jnp.dot(z.astype(jnp.bfloat16), w2_ref[...],
                preferred_element_type=jnp.float32) + b2_ref[...]
    gate = jax.nn.sigmoid(g)                                 # (1, C)
    y = x * gate[:, None, :] + r_ref[...].astype(jnp.float32)
    o_ref[...] = jnp.maximum(y, 0.0).astype(o_ref.dtype)


def se_scale_add_relu(x_bmc, r_bmc, p):
    """relu(x * SE(x) + residual) in one kernel; x is read from HBM once."""
    # TODO(synk): assumes the per-batch (HW, C) activation fits VMEM (true at these
    #             shapes); larger inputs would need a two-pass tiled pooling.
    B, HW, C = x_bmc.shape
    crp = p["w1"].shape[-1]
    return pl.pallas_call(
        functools.partial(_se_scale_add_relu_kernel, inv_hw=1.0 / HW),
        grid=(B,),
        in_specs=[
            pl.BlockSpec((1, HW, C), lambda b: (b, 0, 0)),
            pl.BlockSpec((1, HW, C), lambda b: (b, 0, 0)),
            pl.BlockSpec((C, crp), lambda b: (0, 0)),
            pl.BlockSpec((1, crp), lambda b: (0, 0)),
            pl.BlockSpec((crp, C), lambda b: (0, 0)),
            pl.BlockSpec((1, C), lambda b: (0, 0)),
        ],
        out_specs=pl.BlockSpec((1, HW, C), lambda b: (b, 0, 0)),
        out_shape=jax.ShapeDtypeStruct((B, HW, C), jnp.bfloat16),
        compiler_params=pltpu.CompilerParams(
            dimension_semantics=("parallel",)),
    )(x_bmc, r_bmc, p["w1"], p["b1"], p["w2"], p["b2"])


# ----------------------------------------------------------------------------
# Kernel D: fused final GAP + the three heads (one lane-dense 256-wide GEMM)
# ----------------------------------------------------------------------------

def _gap_heads_kernel(x_ref, w_ref, b_ref, o_ref, *, inv_hw):
    x = x_ref[...].astype(jnp.float32)
    pooled = jnp.sum(x, axis=1) * inv_hw                     # (B, 2048)
    o_ref[...] = jnp.dot(pooled.astype(jnp.bfloat16), w_ref[...],
                         preferred_element_type=jnp.float32) + b_ref[...]


def gap_heads(x_bmc, p):
    B, HW, C = x_bmc.shape
    N = p["w"].shape[-1]
    return pl.pallas_call(
        functools.partial(_gap_heads_kernel, inv_hw=1.0 / HW),
        grid=(1,),
        in_specs=[
            pl.BlockSpec((B, HW, C), lambda i: (0, 0, 0)),
            pl.BlockSpec((C, N), lambda i: (0, 0)),
            pl.BlockSpec((1, N), lambda i: (0, 0)),
        ],
        out_specs=pl.BlockSpec((B, N), lambda i: (0, 0)),
        out_shape=jax.ShapeDtypeStruct((B, N), jnp.float32),
    )(x_bmc, p["w"], p["b"])


def max_pool_3x3_s2_ceil(x):
    # TODO(synk): max-pool kept as lax.reduce_window glue (not a hot path);
    # padding=(0,1) on H/W reproduces ceil_mode=True at these sizes.
    return jax.lax.reduce_window(
        x, jnp.array(-jnp.inf, x.dtype), jax.lax.max,
        window_dimensions=(1, 3, 3, 1),
        window_strides=(1, 2, 2, 1),
        padding=((0, 0), (0, 1), (0, 1), (0, 0)))


# ----------------------------------------------------------------------------
# Deterministic parameter construction (eval-mode BN folded into the weights)
# ----------------------------------------------------------------------------

class _KeyGen:
    def __init__(self, key):
        self.key = key

    def __call__(self):
        self.key, sub = jax.random.split(self.key)
        return sub


def make_conv_bn(kg, cin, cout, kh, kw, groups=1, eps=1e-5):
    """Conv(bias=False) + folded eval BatchNorm.  Grouped weights are packed
    block-diagonally into super-groups so every matmul has >=128 output lanes
    (the extra zero-block MXU FLOPs are free at these row counts)."""
    kk = kh * kw
    gamma = jax.random.uniform(kg(), (cout,), jnp.float32, 0.8, 1.2)
    beta = 0.1 * jax.random.normal(kg(), (cout,), jnp.float32)
    mean = 0.1 * jax.random.normal(kg(), (cout,), jnp.float32)
    var = jax.random.uniform(kg(), (cout,), jnp.float32, 0.5, 1.5)
    scale = gamma / jnp.sqrt(var + eps)
    shift = beta - mean * scale

    if groups == 1:
        fan_in = kk * cin
        w = jax.random.normal(kg(), (fan_in, cout), jnp.float32)
        w = w * math.sqrt(2.0 / fan_in) * scale[None, :]
        return dict(w=w.astype(jnp.bfloat16), b=shift.reshape(1, cout),
                    kh=kh, kw=kw, cout=cout)

    cg, ng = cin // groups, cout // groups
    fan_in = kk * cg
    w = jax.random.normal(kg(), (groups, kk, cg, ng), jnp.float32)
    w = w * math.sqrt(2.0 / fan_in) * scale.reshape(groups, 1, 1, ng)
    n_sg = max(1, cout // 256)            # target 256 output lanes per super-group
    while groups % n_sg or cout % n_sg or cin % n_sg:
        n_sg -= 1
    gpsg = groups // n_sg
    cin_sg, cout_sg = cin // n_sg, cout // n_sg
    wsg = jnp.zeros((n_sg, kk, cin_sg, cout_sg), jnp.float32)
    for g in range(groups):
        sg, l = g // gpsg, g % gpsg
        wsg = wsg.at[sg, :, l * cg:(l + 1) * cg, l * ng:(l + 1) * ng].set(w[g])
    w = wsg.reshape(n_sg * kk, cin_sg, cout_sg)
    return dict(w=w.astype(jnp.bfloat16), b=shift.reshape(1, cout),
                kh=kh, kw=kw, cout=cout,
                n_sg=n_sg, cin_sg=cin_sg, cout_sg=cout_sg)


def make_se(kg, c, reduction):
    """SE module (1x1 conv fc1 / fc2 with bias); hidden width zero-padded to a
    lane-dense 128 multiple (mathematically identical)."""
    cr = c // reduction
    crp = 128 * ((cr + 127) // 128)
    bound1 = 1.0 / math.sqrt(c)
    w1 = jax.random.uniform(kg(), (c, cr), jnp.float32, -bound1, bound1)
    b1 = jax.random.uniform(kg(), (cr,), jnp.float32, -bound1, bound1)
    bound2 = 1.0 / math.sqrt(cr)
    w2 = jax.random.uniform(kg(), (cr, c), jnp.float32, -bound2, bound2)
    b2 = jax.random.uniform(kg(), (c,), jnp.float32, -bound2, bound2)
    w1p = jnp.zeros((c, crp), jnp.float32).at[:, :cr].set(w1)
    b1p = jnp.zeros((1, crp), jnp.float32).at[:, :cr].set(b1)
    w2p = jnp.zeros((crp, c), jnp.float32).at[:cr, :].set(w2)
    return dict(w1=w1p.astype(jnp.bfloat16), b1=b1p,
                w2=w2p.astype(jnp.bfloat16), b2=b2.reshape(1, c))


def make_heads(kg, cin, dims=(168, 11, 7)):
    """fc1/fc2/fc3 fused into one weight, zero-padded to 256 lanes (hoisted
    out of the forward); the wrapper slices 168/11/7 back out."""
    n = sum(dims)
    npad = 128 * ((n + 127) // 128)
    ws, bs = [], []
    for d in dims:
        bound = 1.0 / math.sqrt(cin)
        ws.append(jax.random.uniform(kg(), (cin, d), jnp.float32, -bound, bound))
        bs.append(jax.random.uniform(kg(), (d,), jnp.float32, -bound, bound))
    w = jnp.concatenate(ws, axis=1)
    b = jnp.concatenate(bs)
    wp = jnp.zeros((cin, npad), jnp.float32).at[:, :n].set(w)
    bp = jnp.zeros((1, npad), jnp.float32).at[:, :n].set(b)
    return dict(w=wp.astype(jnp.bfloat16), b=bp, dims=dims)


def init_params(key, groups=32, reduction=16):
    kg = _KeyGen(key)
    params = {"stem": make_conv_bn(kg, 3, 64, 7, 7)}
    # se_resnext50_32x4d stage config (planes, n_blocks, stride), depth trimmed.
    stage_cfg = [(64, 1, 1), (128, 1, 2), (256, 1, 2), (512, 1, 2)]
    inplanes = 64
    stages = []
    for planes, nblocks, stride in stage_cfg:
        blocks = []
        for bi in range(nblocks):
            width = (planes * 4 // 64) * groups    # base_width=4, cardinality=32
            out_ch = planes * 4
            s = stride if bi == 0 else 1
            bp = dict(
                conv1=make_conv_bn(kg, inplanes, width, 1, 1),
                conv2=make_conv_bn(kg, width, width, 3, 3, groups=groups),
                conv3=make_conv_bn(kg, width, out_ch, 1, 1),
                se=make_se(kg, out_ch, reduction),
                stride=s,
            )
            if s != 1 or inplanes != out_ch:
                bp["down"] = make_conv_bn(kg, inplanes, out_ch, 1, 1)
            blocks.append(bp)
            inplanes = out_ch
        stages.append(blocks)
    params["stages"] = stages
    params["heads"] = make_heads(kg, 2048, (168, 11, 7))
    return params


# ----------------------------------------------------------------------------
# Forward pass
# ----------------------------------------------------------------------------

def bottleneck(x, p):
    s = p["stride"]
    out = conv1x1_bn_act(x, p["conv1"], act="relu")
    out = conv3x3_grouped_bn_act(out, p["conv2"], stride=s, padding=1, act="relu")
    out = conv1x1_bn_act(out, p["conv3"], act="none")
    B, H, W, C = out.shape
    if "down" in p:
        residual = conv1x1_bn_act(x, p["down"], act="none", stride=s)
    else:
        residual = x
    y = se_scale_add_relu(out.reshape(B, H * W, C),
                          residual.reshape(B, H * W, C), p["se"])
    return y.reshape(B, H, W, C)


def se_resnext_forward(params, x_nchw):
    """Returns (y1, y2, y3) with shapes (B,168), (B,11), (B,7)."""
    x = jnp.transpose(x_nchw, (0, 2, 3, 1)).astype(jnp.bfloat16)   # NCHW -> NHWC
    x = stem_conv_bn_relu(x, params["stem"])
    x = max_pool_3x3_s2_ceil(x)
    for blocks in params["stages"]:
        for bp in blocks:
            x = bottleneck(x, bp)
    B, H, W, C = x.shape
    y = gap_heads(x.reshape(B, H * W, C), params["heads"])         # (B, 256)
    d1, d2, d3 = params["heads"]["dims"]
    return y[:, :d1], y[:, d1:d1 + d2], y[:, d1 + d2:d1 + d2 + d3]


if __name__ == "__main__":
    key = jax.random.PRNGKey(0)
    pkey, xkey = jax.random.split(key)
    params = init_params(pkey)
    x = jax.random.normal(xkey, (2, 3, 64, 64), jnp.float32)   # NCHW, like PyTorch
    y1, y2, y3 = se_resnext_forward(params, x)
    jax.block_until_ready((y1, y2, y3))
    assert y1.shape == (2, 168) and y2.shape == (2, 11) and y3.shape == (2, 7)
    assert all(bool(jnp.all(jnp.isfinite(y))) for y in (y1, y2, y3))
    print("KERNEL_OK")
</pallas_src>

<mosaic_0001>
module attributes {stable_mosaic.version = 11 : i64} {
  func.func @_gemm_k1_kernel(%arg0: i32, %arg1: i32, %arg2: memref<256x147xbf16, #tpu.memory_space<vmem>>, %arg3: memref<147x64xbf16, #tpu.memory_space<vmem>>, %arg4: memref<1x64xf32, #tpu.memory_space<vmem>>, %arg5: memref<256x64xbf16, #tpu.memory_space<vmem>>) attributes {dimension_semantics = [#tpu.dimension_semantics<parallel>, #tpu.dimension_semantics<parallel>], iteration_bounds = array<i64: 8, 1>, scalar_prefetch = 0 : i64, scratch_operands = 0 : i64, tpu.core_type = #tpu.core_type<tc>, window_params = [{transform_indices = @transform_0, window_bounds = array<i64: 256, 147>}, {transform_indices = @transform_1, window_bounds = array<i64: 147, 64>}, {transform_indices = @transform_2, window_bounds = array<i64: 1, 64>}, {transform_indices = @transform_3, window_bounds = array<i64: 256, 64>}]} {
    %c0 = arith.constant 0 : index
    %c0_0 = arith.constant 0 : index
    %0 = vector.load %arg2[%c0, %c0_0] : memref<256x147xbf16, #tpu.memory_space<vmem>>, vector<256x147xbf16>
    %c0_1 = arith.constant 0 : index
    %c0_2 = arith.constant 0 : index
    %1 = vector.load %arg3[%c0_1, %c0_2] : memref<147x64xbf16, #tpu.memory_space<vmem>>, vector<147x64xbf16>
    %cst = arith.constant dense<0.000000e+00> : vector<256x64xf32>
    %2 = tpu.matmul %0, %1, %cst {dimension_numbers = #tpu.dot_dimension_numbers<[1], [0], [0], [1], [0, 0, 1, 1], [], []>} : vector<256x147xbf16>, vector<147x64xbf16>, vector<256x64xf32> -> vector<256x64xf32>
    %c0_3 = arith.constant 0 : index
    %c0_4 = arith.constant 0 : index
    %3 = vector.load %arg4[%c0_3, %c0_4] : memref<1x64xf32, #tpu.memory_space<vmem>>, vector<1x64xf32>
    %4 = vector.broadcast %3 : vector<1x64xf32> to vector<256x64xf32>
    %5 = arith.addf %2, %4 : vector<256x64xf32>
    %cst_5 = arith.constant 0.000000e+00 : f32
    %6 = vector.broadcast %cst_5 : f32 to vector<256x64xf32>
    %7 = arith.maximumf %5, %6 : vector<256x64xf32>
    %8 = arith.truncf %7 : vector<256x64xf32> to vector<256x64xbf16>
    %c0_6 = arith.constant 0 : index
    %c0_7 = arith.constant 0 : index
    %9 = vector.load %arg5[%c0_6, %c0_7] : memref<256x64xbf16, #tpu.memory_space<vmem>>, vector<256x64xbf16>
    tpu.vector_store %arg5[%c0_6, %c0_7], %8 {strides = array<i32>} : memref<256x64xbf16, #tpu.memory_space<vmem>>, vector<256x64xbf16>,
    return
  }
  func.func @transform_0(%arg0: i32, %arg1: i32) -> (i32, i32) {
    %c0_i32 = arith.constant 0 : i32
    %c0_i32_0 = arith.constant 0 : i32
    return %arg0, %c0_i32 : i32, i32
  }
  func.func @transform_1(%arg0: i32, %arg1: i32) -> (i32, i32) {
    %c0_i32 = arith.constant 0 : i32
    %c0_i32_0 = arith.constant 0 : i32
    return %c0_i32, %arg1 : i32, i32
  }
  func.func @transform_2(%arg0: i32, %arg1: i32) -> (i32, i32) {
    %c0_i32 = arith.constant 0 : i32
    %c0_i32_0 = arith.constant 0 : i32
    return %c0_i32, %arg1 : i32, i32
  }
  func.func @transform_3(%arg0: i32, %arg1: i32) -> (i32, i32) {
    %c0_i32 = arith.constant 0 : i32
    return %arg0, %arg1 : i32, i32
  }
}

</mosaic_0001>

<bundles_post_ra>
// kernel: tpu_custom_call.1
= control target key start
LH: loop header
LB: loop body
LE: loop exit
PB: predicated region body
PF: predicated region fallthrough
CT: control target
= control target key end

     0   :  { %s1288_s12 = smov 0   ;;  %s1290_s13 = smov 0   ;;  %s1508_s0 = inlined_call_operand.vmem [shape: bf16[2048,147], index: 0, kind: input, shape index: {}]   ;;  %s1509_s1 = inlined_call_operand.vmem [shape: bf16[147,64], index: 1, kind: input, shape index: {}]   ;;  %s1510_s2 = inlined_call_operand.vmem [shape: f32[1,64], index: 2, kind: input, shape index: {}]   ;;  %s1511_s3 = inlined_call_operand.vmem [shape: bf16[2048,64], index: 3, kind: output, shape index: {}]  }
   0x1   :  { %s1292_s14 = smov 0  }
   0x2 LB: > { %s25_s15 = sadd.s32 1, %s1260_s13  ;;  %p1006_p0 = scmp.ge.s32.totalorder %s1264_s14, 1  ;;  %s1264_s14 = sphi %s1292_s14, %s13_s14   ;;  %s1260_s13 = sphi %s1290_s13, %s1513_s13   ;;  %s1256_s12 = sphi %s1288_s12, %s1512_s12  }
   0x3   : > { %p27_p1 = scmp.ge.s32.totalorder %s25_s15, 8  ;;  %p170_p2 = scmp.lt.s32.totalorder %s1264_s14, 9 }
   0x5   : > { %s1515_s15 = smov (%p27_p1, %s25_s15), 0  ;;  %p171_p3 = pnand %p1006_p0, %p170_p2 }
   0x6   : > { %v1184_v0 = vld [vmem:[%s1509_s1] sm:$0xff] (!%p171_p3)   ;;  %v1266_v1 = vmov (!%p171_p3), 0   ;;  %v1185_v2 = vld [vmem:[%s1509_s1 + $0x8] sm:$0xff] (!%p171_p3)   ;;  %v1186_v3 = vld [vmem:[%s1509_s1 + $0x10] sm:$0xff] (!%p171_p3)   ;;  %s1007_s22 = sshll.u32 (!%p171_p3), %s1256_s12, 5  ;;  %vm488_vm0 = vcmask (!%p171_p3), 154624  }
   0x7   : > { %174 = sbr.rel (%p171_p3) target bundleno = 324 (0x144), region = 32  ;;  %544 = vmatprep.subr.bf16.mxu0 (!%p171_p3), %v1266_v1  ;;  %1138 = vmatprep.subr.bf16.mxu1 (!%p171_p3), %v1266_v1  ;;  %p206_p4 = scmp.lt.s32.totalorder (!%p171_p3), %s1007_s22, 255  ;;  %v1187_v4 = vld [vmem:[%s1509_s1 + $0x18] sm:$0xff] (!%p171_p3)   ;;  %v1188_v5 = vld [vmem:[%s1509_s1 + $0x20] sm:$0xff] (!%p171_p3)   ;;  %v1189_v8 = vld [vmem:[%s1509_s1 + $0x28] sm:$0xff] (!%p171_p3)   ;;  %vm537_vm1 = vcmask (!%p171_p3), 1040384  }
   0x8   : > { %545 = vmatpush1.bf16.msra.mxu0 (!%p171_p3), %v1184_v0  ;;  %1148 = vmatpush1.bf16.msra.mxu1 (!%p171_p3), %v1184_v0  ;;  %v1190_v9 = vld [vmem:[%s1509_s1 + $0x30] sm:$0xff] (!%p171_p3)   ;;  %v1191_v10 = vld [vmem:[%s1509_s1 + $0x38] sm:$0xff] (!%p171_p3)   ;;  %vm538_vm2 = vcmask (!%p171_p3), 1041408   ;;  %v1267_v11 = vmov (!%p171_p3), 65535   ;;  %v1192_v13 = vld [vmem:[%s1509_s1 + $0x40] sm:$0xff] (!%p171_p3)   ;;  %vm865_vm3 = vcmask (!%p171_p3), 519168  }
   0x9   : > { %546 = vmatprep.subr.bf16.mxu0 (!%p171_p3), %v1266_v1  ;;  %1139 = vmatprep.subr.bf16.mxu1 (!%p171_p3), %v1266_v1  ;;  %v539_v12 = vsel (!%p171_p3), %vm537_vm1, 4294967295, %v1267_v11  ;;  %v1193_v14 = vld [vmem:[%s1509_s1 + $0x48] ss:$0 sps:$4 sm:$0x33] (!%p171_p3)   ;;  %v1395_v47 = vld [vmem:[%s1510_s2] ss:$0 sm:$0xff] (!%p171_p3) }
   0xa   : > { %v540_v15 = vsel (!%p171_p3), %vm538_vm2, %v539_v12, 0 }
   0xb   : > { %v542_v16 = vand.u32 (!%p171_p3), %v1193_v14, %v540_v15 }
   0xc   : > { %547 = vmatpush1.bf16.msra.mxu0 (!%p171_p3), %v1185_v2  ;;  %1149 = vmatpush1.bf16.msra.mxu1 (!%p171_p3), %v1185_v2 }
   0xd   : > { %548 = vmatprep.subr.bf16.mxu0 (!%p171_p3), %v1266_v1  ;;  %1140 = vmatprep.subr.bf16.mxu1 (!%p171_p3), %v1266_v1 }
   0xe   : > { %s1517_s22 = smov (!%p206_p4, %s1007_s22), 255 }
   0xf   : > { %s1105_s25 = sshll.u32 %s1517_s22, 3  ;;  %s1011_s19 = sshll.u32 %s1517_s22, 2 }
  0x10   : > { %549 = vmatpush1.bf16.msra.mxu0 %v1186_v3  ;;  %1150 = vmatpush1.bf16.msra.mxu1 %v1186_v3  ;;  %s1324_s28 = scalar_lea.vmem %s1508_s0, %s1105_s25  ;;  %s1405_s22 = scalar_lea.vmem %s1511_s3, %s1011_s19 }
  0x11   : > { %550 = vmatprep.subr.bf16.mxu0 %v1266_v1  ;;  %1141 = vmatprep.subr.bf16.mxu1 %v1266_v1  ;;  %v1196_v6 = vld [vmem:[%s1324_s28 + $0x4] ss:$8 sps:$4 sm:$0xff]   ;;  %v1194_v17 = vld [vmem:[%s1324_s28] ss:$8 sps:$4 sm:$0xff]   ;;  %v1200_v19 = vld [vmem:[%s1324_s28 + $0x14] ss:$8 sps:$4 sm:$0xff]  }
  0x12   : > { %v1199_v7 = vld [vmem:[%s1324_s28 + $0x84] ss:$8 sps:$4 sm:$0xff]   ;;  %1055 = vmatprep.mubr.msk.bf16.mxu0 %vm488_vm0, %v1196_v6  ;;  %v1197_v18 = vld [vmem:[%s1324_s28 + $0x80] ss:$8 sps:$4 sm:$0xff]   ;;  %v1202_v20 = vld [vmem:[%s1324_s28 + $0x94] ss:$8 sps:$4 sm:$0xff]  }
  0x13   : > { %1063 = vmatprep.mubr.msk.bf16.mxu1 %vm488_vm0, %v1199_v7  ;;  %v1204_v21 = vld [vmem:[%s1324_s28 + $0x10] ss:$8 sps:$4 sm:$0xff]   ;;  %v1206_v23 = vld [vmem:[%s1324_s28 + $0x24] ss:$8 sps:$4 sm:$0xff]   ;;  %v1210_v25 = vld [vmem:[%s1324_s28 + $0x20] ss:$8 sps:$4 sm:$0xff]  }
  0x14   : > { %551 = vmatpush1.bf16.msra.mxu0 %v1187_v4  ;;  %1151 = vmatpush1.bf16.msra.mxu1 %v1187_v4  ;;  %v1205_v22 = vld [vmem:[%s1324_s28 + $0x90] ss:$8 sps:$4 sm:$0xff]   ;;  %v1208_v24 = vld [vmem:[%s1324_s28 + $0xa4] ss:$8 sps:$4 sm:$0xff]   ;;  %v1211_v26 = vld [vmem:[%s1324_s28 + $0xa0] ss:$8 sps:$4 sm:$0xff]  }
  0x15   : > { %552 = vmatprep.subr.bf16.mxu0 %v1266_v1  ;;  %1142 = vmatprep.subr.bf16.mxu1 %v1266_v1  ;;  %v1212_v27 = vld [vmem:[%s1324_s28 + $0x34] ss:$8 sps:$4 sm:$0xff]   ;;  %v1216_v29 = vld [vmem:[%s1324_s28 + $0x30] ss:$8 sps:$4 sm:$0xff]   ;;  %v1218_v31 = vld [vmem:[%s1324_s28 + $0x44] ss:$8 sps:$4 sm:$0xff]  }
  0x16   : > { %v1214_v28 = vld [vmem:[%s1324_s28 + $0xb4] ss:$8 sps:$4 sm:$0xff]   ;;  %v1217_v30 = vld [vmem:[%s1324_s28 + $0xb0] ss:$8 sps:$4 sm:$0xff]   ;;  %v1220_v32 = vld [vmem:[%s1324_s28 + $0xc4] ss:$8 sps:$4 sm:$0xff]  }
  0x17   : > { %v1222_v33 = vld [vmem:[%s1324_s28 + $0x40] ss:$8 sps:$4 sm:$0xff]   ;;  %v1224_v35 = vld [vmem:[%s1324_s28 + $0x54] ss:$8 sps:$4 sm:$0xff]   ;;  %v1228_v37 = vld [vmem:[%s1324_s28 + $0x50] ss:$8 sps:$4 sm:$0xff]  }
  0x18   : > { %553 = vmatpush1.bf16.msra.mxu0 %v1188_v5  ;;  %1152 = vmatpush1.bf16.msra.mxu1 %v1188_v5  ;;  %v1223_v34 = vld [vmem:[%s1324_s28 + $0xc0] ss:$8 sps:$4 sm:$0xff]   ;;  %v1226_v36 = vld [vmem:[%s1324_s28 + $0xd4] ss:$8 sps:$4 sm:$0xff]   ;;  %v1229_v38 = vld [vmem:[%s1324_s28 + $0xd0] ss:$8 sps:$4 sm:$0xff]  }
  0x19   : > { %554 = vmatprep.subr.bf16.mxu0 %v1266_v1  ;;  %1143 = vmatprep.subr.bf16.mxu1 %v1266_v1  ;;  %v1230_v39 = vld [vmem:[%s1324_s28 + $0x64] ss:$8 sps:$4 sm:$0xff]   ;;  %v1234_v41 = vld [vmem:[%s1324_s28 + $0x60] ss:$8 sps:$4 sm:$0xff]   ;;  %v1236_v43 = vld [vmem:[%s1324_s28 + $0x74] ss:$8 sps:$4 sm:$0xff]  }
  0x1a   : > { %v1232_v40 = vld [vmem:[%s1324_s28 + $0xe4] ss:$8 sps:$4 sm:$0xff]   ;;  %v1235_v42 = vld [vmem:[%s1324_s28 + $0xe0] ss:$8 sps:$4 sm:$0xff]   ;;  %v1238_v44 = vld [vmem:[%s1324_s28 + $0xf4] ss:$8 sps:$4 sm:$0xff]  }
  0x1b   : > { %v1240_v45 = vld [vmem:[%s1324_s28 + $0x70] ss:$8 sps:$4 sm:$0xff]  }
  0x1c   : > { %555 = vmatpush1.bf16.msra.mxu0 %v1189_v8  ;;  %1153 = vmatpush1.bf16.msra.mxu1 %v1189_v8  ;;  %v1241_v46 = vld [vmem:[%s1324_s28 + $0xf0] ss:$8 sps:$4 sm:$0xff]  }
  0x1d   : > { %556 = vmatprep.subr.bf16.mxu0 %v1266_v1  ;;  %1144 = vmatprep.subr.bf16.mxu1 %v1266_v1 }
  0x20   : > { %557 = vmatpush1.bf16.msra.mxu0 %v1190_v9  ;;  %1154 = vmatpush1.bf16.msra.mxu1 %v1190_v9 }
  0x21   : > { %558 = vmatprep.subr.bf16.mxu0 %v1266_v1  ;;  %1145 = vmatprep.subr.bf16.mxu1 %v1266_v1 }
  0x24   : > { %559 = vmatpush1.bf16.msra.mxu0 %v1191_v10  ;;  %1155 = vmatpush1.bf16.msra.mxu1 %v1191_v10 }
  0x25   : > { %560 = vmatprep.subr.bf16.mxu0 %v1266_v1  ;;  %1146 = vmatprep.subr.bf16.mxu1 %v1266_v1 }
  0x28   : > { %561 = vmatpush1.bf16.msra.mxu0 %v1192_v13  ;;  %1156 = vmatpush1.bf16.msra.mxu1 %v1192_v13 }
  0x29   : > { %562 = vmatprep.subr.bf16.mxu0 %v1266_v1  ;;  %1147 = vmatprep.subr.bf16.mxu1 %v1266_v1 }
  0x2c   : > { %563 = vmatpush1.bf16.msra.mxu0 %v542_v16  ;;  %1157 = vmatpush1.bf16.msra.mxu1 %v542_v16 }
  0x2f   : > { %577 = vmatmul.mubr.bf16.vlgmr.msra.gmra.mrb[0].mxu0 %v1194_v17  ;;  %641 = vmatmul.mubr.bf16.vlgmr.msra.gmra.mrb[0].mxu1 %v1197_v18 }
  0x30   : > { %1056 = vmatprep.mubr.msk.bf16.mxu0 %vm488_vm0, %v1200_v19  ;;  %1064 = vmatprep.mubr.msk.bf16.mxu1 %vm488_vm0, %v1202_v20 }
  0x37   : > { %585 = vmatmul.mubr.bf16.gmra.mrb[4].mxu0 %v1204_v21  ;;  %649 = vmatmul.mubr.bf16.gmra.mrb[4].mxu1 %v1205_v22 }
  0x38   : > { %1057 = vmatprep.mubr.msk.bf16.mxu0 %vm488_vm0, %v1206_v23  ;;  %1065 = vmatprep.mubr.msk.bf16.mxu1 %vm488_vm0, %v1208_v24 }
  0x3f   : > { %593 = vmatmul.mubr.bf16.gmra.mrb[8].mxu0 %v1210_v25  ;;  %657 = vmatmul.mubr.bf16.gmra.mrb[8].mxu1 %v1211_v26 }
  0x40   : > { %1058 = vmatprep.mubr.msk.bf16.mxu0 %vm488_vm0, %v1212_v27  ;;  %1066 = vmatprep.mubr.msk.bf16.mxu1 %vm488_vm0, %v1214_v28 }
  0x47   : > { %601 = vmatmul.mubr.bf16.gmra.mrb[12].mxu0 %v1216_v29  ;;  %665 = vmatmul.mubr.bf16.gmra.mrb[12].mxu1 %v1217_v30 }
  0x48   : > { %1059 = vmatprep.mubr.msk.bf16.mxu0 %vm488_vm0, %v1218_v31  ;;  %1067 = vmatprep.mubr.msk.bf16.mxu1 %vm488_vm0, %v1220_v32 }
  0x4f   : > { %609 = vmatmul.mubr.bf16.gmra.mrb[16].mxu0 %v1222_v33  ;;  %673 = vmatmul.mubr.bf16.gmra.mrb[16].mxu1 %v1223_v34 }
  0x50   : > { %1060 = vmatprep.mubr.msk.bf16.mxu0 %vm488_vm0, %v1224_v35  ;;  %1068 = vmatprep.mubr.msk.bf16.mxu1 %vm488_vm0, %v1226_v36 }
  0x57   : > { %617 = vmatmul.mubr.bf16.gmra.mrb[20].mxu0 %v1228_v37  ;;  %681 = vmatmul.mubr.bf16.gmra.mrb[20].mxu1 %v1229_v38 }
  0x58   : > { %1061 = vmatprep.mubr.msk.bf16.mxu0 %vm488_vm0, %v1230_v39  ;;  %1069 = vmatprep.mubr.msk.bf16.mxu1 %vm488_vm0, %v1232_v40 }
  0x5f   : > { %625 = vmatmul.mubr.bf16.gmra.mrb[24].mxu0 %v1234_v41  ;;  %689 = vmatmul.mubr.bf16.gmra.mrb[24].mxu1 %v1235_v42 }
  0x60   : > { %1062 = vmatprep.mubr.msk.bf16.mxu0 %vm488_vm0, %v1236_v43  ;;  %1070 = vmatprep.mubr.msk.bf16.mxu1 %vm488_vm0, %v1238_v44 }
  0x67   : > { %633 = vmatmul.mubr.bf16.gmra.mrb[28].mxu0 %v1240_v45  ;;  %697 = vmatmul.mubr.bf16.gmra.mrb[28].mxu1 %v1241_v46 }
 0x102   : > { %v578_v48 = vpop.f32.mrb[0].mxu0  ;;  %v642_v49 = vpop.f32.mrb[0].mxu1 }
 0x103   : > { %v579_v50 = vadd.f32 %v1395_v47, %v578_v48  ;;  %v643_v51 = vadd.f32 %v1395_v47, %v642_v49  ;;  %v580_v52 = vpop.f32.mrb[1].mxu0  ;;  %v644_v53 = vpop.f32.mrb[1].mxu1 }
 0x104   : > { %v581_v54 = vpop.f32.mrb[2].mxu0  ;;  %v645_v55 = vpop.f32.mrb[2].mxu1 }
 0x105   : > { %v705_v56 = vmax.f32 %v579_v50, 0.0  ;;  %v721_v57 = vmax.f32 %v643_v51, 0.0  ;;  %v582_v58 = vadd.f32 %v1395_v47, %v581_v54  ;;  %v646_v59 = vadd.f32 %v1395_v47, %v645_v55  ;;  %v583_v60 = vpop.f32.mrb[3].mxu0  ;;  %v647_v61 = vpop.f32.mrb[3].mxu1 }
 0x107   : > { %v1106_v62 = vpack.c.bf16 %v705_v56, %v705_v56  ;;  %v1122_v63 = vpack.c.bf16 %v721_v57, %v721_v57  ;;  %v706_v0 = vmax.f32 %v582_v58, 0.0  ;;  %v722_v1 = vmax.f32 %v646_v59, 0.0 }
 0x109   : > { %866 = vst.msk [vmem:[%s1405_s22] sm:$0xf] %vm865_vm3, %v1106_v62  ;;  %882 = vst.msk [vmem:[%s1405_s22 + $0x40] sm:$0xf] %vm865_vm3, %v1122_v63  ;;  %v1107_v2 = vpack.c.bf16 %v706_v0, %v706_v0  ;;  %v1123_v3 = vpack.c.bf16 %v722_v1, %v722_v1 }
 0x10a   : > { %v586_v4 = vpop.f32.mrb[4].mxu0  ;;  %v650_v5 = vpop.f32.mrb[4].mxu1 }
 0x10b   : > { %867 = vst.msk [vmem:[%s1405_s22 + $0x4] sm:$0xf] %vm865_vm3, %v1107_v2  ;;  %883 = vst.msk [vmem:[%s1405_s22 + $0x44] sm:$0xf] %vm865_vm3, %v1123_v3  ;;  %v587_v6 = vadd.f32 %v1395_v47, %v586_v4  ;;  %v651_v7 = vadd.f32 %v1395_v47, %v650_v5  ;;  %v588_v8 = vpop.f32.mrb[5].mxu0  ;;  %v652_v9 = vpop.f32.mrb[5].mxu1 }
 0x10c   : > { %v589_v10 = vpop.f32.mrb[6].mxu0  ;;  %v653_v11 = vpop.f32.mrb[6].mxu1 }
 0x10d   : > { %v707_v12 = vmax.f32 %v587_v6, 0.0  ;;  %v723_v13 = vmax.f32 %v651_v7, 0.0  ;;  %v590_v14 = vadd.f32 %v1395_v47, %v589_v10  ;;  %v654_v15 = vadd.f32 %v1395_v47, %v653_v11  ;;  %v591_v16 = vpop.f32.mrb[7].mxu0  ;;  %v655_v17 = vpop.f32.mrb[7].mxu1 }
 0x10f   : > { %v1108_v18 = vpack.c.bf16 %v707_v12, %v707_v12  ;;  %v1124_v19 = vpack.c.bf16 %v723_v13, %v723_v13  ;;  %v708_v20 = vmax.f32 %v590_v14, 0.0  ;;  %v724_v21 = vmax.f32 %v654_v15, 0.0 }
 0x111   : > { %868 = vst.msk [vmem:[%s1405_s22 + $0x8] sm:$0xf] %vm865_vm3, %v1108_v18  ;;  %884 = vst.msk [vmem:[%s1405_s22 + $0x48] sm:$0xf] %vm865_vm3, %v1124_v19  ;;  %v1109_v22 = vpack.c.bf16 %v708_v20, %v708_v20  ;;  %v1125_v23 = vpack.c.bf16 %v724_v21, %v724_v21 }
 0x112   : > { %v594_v24 = vpop.f32.mrb[8].mxu0  ;;  %v658_v25 = vpop.f32.mrb[8].mxu1 }
 0x113   : > { %869 = vst.msk [vmem:[%s1405_s22 + $0xc] sm:$0xf] %vm865_vm3, %v1109_v22  ;;  %885 = vst.msk [vmem:[%s1405_s22 + $0x4c] sm:$0xf] %vm865_vm3, %v1125_v23  ;;  %v595_v26 = vadd.f32 %v1395_v47, %v594_v24  ;;  %v659_v27 = vadd.f32 %v1395_v47, %v658_v25  ;;  %v596_v28 = vpop.f32.mrb[9].mxu0  ;;  %v660_v29 = vpop.f32.mrb[9].mxu1 }
 0x114   : > { %v597_v30 = vpop.f32.mrb[10].mxu0  ;;  %v661_v31 = vpop.f32.mrb[10].mxu1 }
 0x115   : > { %v709_v32 = vmax.f32 %v595_v26, 0.0  ;;  %v725_v33 = vmax.f32 %v659_v27, 0.0  ;;  %v598_v34 = vadd.f32 %v1395_v47, %v597_v30  ;;  %v662_v35 = vadd.f32 %v1395_v47, %v661_v31  ;;  %v599_v36 = vpop.f32.mrb[11].mxu0  ;;  %v663_v37 = vpop.f32.mrb[11].mxu1 }
 0x117   : > { %v1110_v38 = vpack.c.bf16 %v709_v32, %v709_v32  ;;  %v1126_v39 = vpack.c.bf16 %v725_v33, %v725_v33  ;;  %v710_v40 = vmax.f32 %v598_v34, 0.0  ;;  %v726_v41 = vmax.f32 %v662_v35, 0.0 }
 0x119   : > { %870 = vst.msk [vmem:[%s1405_s22 + $0x10] sm:$0xf] %vm865_vm3, %v1110_v38  ;;  %886 = vst.msk [vmem:[%s1405_s22 + $0x50] sm:$0xf] %vm865_vm3, %v1126_v39  ;;  %v1111_v42 = vpack.c.bf16 %v710_v40, %v710_v40  ;;  %v1127_v43 = vpack.c.bf16 %v726_v41, %v726_v41 }
 0x11a   : > { %v602_v44 = vpop.f32.mrb[12].mxu0  ;;  %v666_v45 = vpop.f32.mrb[12].mxu1 }
 0x11b   : > { %871 = vst.msk [vmem:[%s1405_s22 + $0x14] sm:$0xf] %vm865_vm3, %v1111_v42  ;;  %887 = vst.msk [vmem:[%s1405_s22 + $0x54] sm:$0xf] %vm865_vm3, %v1127_v43  ;;  %v603_v46 = vadd.f32 %v1395_v47, %v602_v44  ;;  %v667_v48 = vadd.f32 %v1395_v47, %v666_v45  ;;  %v604_v49 = vpop.f32.mrb[13].mxu0  ;;  %v668_v50 = vpop.f32.mrb[13].mxu1 }
 0x11c   : > { %v605_v51 = vpop.f32.mrb[14].mxu0  ;;  %v669_v52 = vpop.f32.mrb[14].mxu1 }
 0x11d   : > { %v711_v53 = vmax.f32 %v603_v46, 0.0  ;;  %v727_v54 = vmax.f32 %v667_v48, 0.0  ;;  %v606_v55 = vadd.f32 %v1395_v47, %v605_v51  ;;  %v670_v56 = vadd.f32 %v1395_v47, %v669_v52  ;;  %v607_v57 = vpop.f32.mrb[15].mxu0  ;;  %v671_v58 = vpop.f32.mrb[15].mxu1 }
 0x11f   : > { %v1112_v59 = vpack.c.bf16 %v711_v53, %v711_v53  ;;  %v1128_v60 = vpack.c.bf16 %v727_v54, %v727_v54  ;;  %v712_v61 = vmax.f32 %v606_v55, 0.0  ;;  %v728_v62 = vmax.f32 %v670_v56, 0.0 }
 0x121   : > { %872 = vst.msk [vmem:[%s1405_s22 + $0x18] sm:$0xf] %vm865_vm3, %v1112_v59  ;;  %888 = vst.msk [vmem:[%s1405_s22 + $0x58] sm:$0xf] %vm865_vm3, %v1128_v60  ;;  %v1113_v63 = vpack.c.bf16 %v712_v61, %v712_v61  ;;  %v1129_v0 = vpack.c.bf16 %v728_v62, %v728_v62 }
 0x122   : > { %v610_v1 = vpop.f32.mrb[16].mxu0  ;;  %v674_v2 = vpop.f32.mrb[16].mxu1 }
 0x123   : > { %873 = vst.msk [vmem:[%s1405_s22 + $0x1c] sm:$0xf] %vm865_vm3, %v1113_v63  ;;  %889 = vst.msk [vmem:[%s1405_s22 + $0x5c] sm:$0xf] %vm865_vm3, %v1129_v0  ;;  %v611_v3 = vadd.f32 %v1395_v47, %v610_v1  ;;  %v675_v4 = vadd.f32 %v1395_v47, %v674_v2  ;;  %v612_v5 = vpop.f32.mrb[17].mxu0  ;;  %v676_v6 = vpop.f32.mrb[17].mxu1 }
 0x124   : > { %v613_v7 = vpop.f32.mrb[18].mxu0  ;;  %v677_v8 = vpop.f32.mrb[18].mxu1 }
 0x125   : > { %v713_v9 = vmax.f32 %v611_v3, 0.0  ;;  %v729_v10 = vmax.f32 %v675_v4, 0.0  ;;  %v614_v11 = vadd.f32 %v1395_v47, %v613_v7  ;;  %v678_v12 = vadd.f32 %v1395_v47, %v677_v8  ;;  %v615_v13 = vpop.f32.mrb[19].mxu0  ;;  %v679_v14 = vpop.f32.mrb[19].mxu1 }
 0x127   : > { %v1114_v15 = vpack.c.bf16 %v713_v9, %v713_v9  ;;  %v1130_v16 = vpack.c.bf16 %v729_v10, %v729_v10  ;;  %v714_v17 = vmax.f32 %v614_v11, 0.0  ;;  %v730_v18 = vmax.f32 %v678_v12, 0.0 }
 0x129   : > { %874 = vst.msk [vmem:[%s1405_s22 + $0x20] sm:$0xf] %vm865_vm3, %v1114_v15  ;;  %890 = vst.msk [vmem:[%s1405_s22 + $0x60] sm:$0xf] %vm865_vm3, %v1130_v16  ;;  %v1115_v19 = vpack.c.bf16 %v714_v17, %v714_v17  ;;  %v1131_v20 = vpack.c.bf16 %v730_v18, %v730_v18 }
 0x12a   : > { %v618_v21 = vpop.f32.mrb[20].mxu0  ;;  %v682_v22 = vpop.f32.mrb[20].mxu1 }
 0x12b   : > { %875 = vst.msk [vmem:[%s1405_s22 + $0x24] sm:$0xf] %vm865_vm3, %v1115_v19  ;;  %891 = vst.msk [vmem:[%s1405_s22 + $0x64] sm:$0xf] %vm865_vm3, %v1131_v20  ;;  %v619_v23 = vadd.f32 %v1395_v47, %v618_v21  ;;  %v683_v24 = vadd.f32 %v1395_v47, %v682_v22  ;;  %v620_v25 = vpop.f32.mrb[21].mxu0  ;;  %v684_v26 = vpop.f32.mrb[21].mxu1 }
 0x12c   : > { %v621_v27 = vpop.f32.mrb[22].mxu0  ;;  %v685_v28 = vpop.f32.mrb[22].mxu1 }
 0x12d   : > { %v715_v29 = vmax.f32 %v619_v23, 0.0  ;;  %v731_v30 = vmax.f32 %v683_v24, 0.0  ;;  %v622_v31 = vadd.f32 %v1395_v47, %v621_v27  ;;  %v686_v32 = vadd.f32 %v1395_v47, %v685_v28  ;;  %v623_v33 = vpop.f32.mrb[23].mxu0  ;;  %v687_v34 = vpop.f32.mrb[23].mxu1 }
 0x12f   : > { %v1116_v35 = vpack.c.bf16 %v715_v29, %v715_v29  ;;  %v1132_v36 = vpack.c.bf16 %v731_v30, %v731_v30  ;;  %v716_v37 = vmax.f32 %v622_v31, 0.0  ;;  %v732_v38 = vmax.f32 %v686_v32, 0.0 }
 0x131   : > { %876 = vst.msk [vmem:[%s1405_s22 + $0x28] sm:$0xf] %vm865_vm3, %v1116_v35  ;;  %892 = vst.msk [vmem:[%s1405_s22 + $0x68] sm:$0xf] %vm865_vm3, %v1132_v36  ;;  %v1117_v39 = vpack.c.bf16 %v716_v37, %v716_v37  ;;  %v1133_v40 = vpack.c.bf16 %v732_v38, %v732_v38 }
 0x132   : > { %v626_v41 = vpop.f32.mrb[24].mxu0  ;;  %v690_v42 = vpop.f32.mrb[24].mxu1 }
 0x133   : > { %877 = vst.msk [vmem:[%s1405_s22 + $0x2c] sm:$0xf] %vm865_vm3, %v1117_v39  ;;  %893 = vst.msk [vmem:[%s1405_s22 + $0x6c] sm:$0xf] %vm865_vm3, %v1133_v40  ;;  %v627_v43 = vadd.f32 %v1395_v47, %v626_v41  ;;  %v691_v44 = vadd.f32 %v1395_v47, %v690_v42  ;;  %v628_v45 = vpop.f32.mrb[25].mxu0  ;;  %v692_v46 = vpop.f32.mrb[25].mxu1 }
 0x134   : > { %v629_v48 = vpop.f32.mrb[26].mxu0  ;;  %v693_v49 = vpop.f32.mrb[26].mxu1 }
 0x135   : > { %v717_v50 = vmax.f32 %v627_v43, 0.0  ;;  %v733_v51 = vmax.f32 %v691_v44, 0.0  ;;  %v630_v52 = vadd.f32 %v1395_v47, %v629_v48  ;;  %v694_v53 = vadd.f32 %v1395_v47, %v693_v49  ;;  %v631_v54 = vpop.f32.mrb[27].mxu0  ;;  %v695_v55 = vpop.f32.mrb[27].mxu1 }
 0x137   : > { %v1118_v56 = vpack.c.bf16 %v717_v50, %v717_v50  ;;  %v1134_v57 = vpack.c.bf16 %v733_v51, %v733_v51  ;;  %v718_v58 = vmax.f32 %v630_v52, 0.0  ;;  %v734_v59 = vmax.f32 %v694_v53, 0.0 }
 0x139   : > { %878 = vst.msk [vmem:[%s1405_s22 + $0x30] sm:$0xf] %vm865_vm3, %v1118_v56  ;;  %894 = vst.msk [vmem:[%s1405_s22 + $0x70] sm:$0xf] %vm865_vm3, %v1134_v57  ;;  %v1119_v60 = vpack.c.bf16 %v718_v58, %v718_v58  ;;  %v1135_v61 = vpack.c.bf16 %v734_v59, %v734_v59 }
 0x13a   : > { %v634_v62 = vpop.f32.mrb[28].mxu0  ;;  %v698_v63 = vpop.f32.mrb[28].mxu1 }
 0x13b   : > { %879 = vst.msk [vmem:[%s1405_s22 + $0x34] sm:$0xf] %vm865_vm3, %v1119_v60  ;;  %895 = vst.msk [vmem:[%s1405_s22 + $0x74] sm:$0xf] %vm865_vm3, %v1135_v61  ;;  %v635_v0 = vadd.f32 %v1395_v47, %v634_v62  ;;  %v699_v1 = vadd.f32 %v1395_v47, %v698_v63  ;;  %v636_v2 = vpop.f32.mrb[29].mxu0  ;;  %v700_v3 = vpop.f32.mrb[29].mxu1 }
 0x13c   : > { %v637_v4 = vpop.f32.mrb[30].mxu0  ;;  %v701_v5 = vpop.f32.mrb[30].mxu1 }
 0x13d   : > { %v719_v6 = vmax.f32 %v635_v0, 0.0  ;;  %v735_v7 = vmax.f32 %v699_v1, 0.0  ;;  %v638_v8 = vadd.f32 %v1395_v47, %v637_v4  ;;  %v702_v9 = vadd.f32 %v1395_v47, %v701_v5  ;;  %v639_v10 = vpop.f32.mrb[31].mxu0  ;;  %v703_v11 = vpop.f32.mrb[31].mxu1 }
 0x13f   : > { %v1120_v12 = vpack.c.bf16 %v719_v6, %v719_v6  ;;  %v1136_v13 = vpack.c.bf16 %v735_v7, %v735_v7  ;;  %v720_v14 = vmax.f32 %v638_v8, 0.0  ;;  %v736_v15 = vmax.f32 %v702_v9, 0.0 }
 0x141   : > { %880 = vst.msk [vmem:[%s1405_s22 + $0x38] sm:$0xf] %vm865_vm3, %v1120_v12  ;;  %896 = vst.msk [vmem:[%s1405_s22 + $0x78] sm:$0xf] %vm865_vm3, %v1136_v13  ;;  %v1121_v16 = vpack.c.bf16 %v720_v14, %v720_v14  ;;  %v1137_v17 = vpack.c.bf16 %v736_v15, %v736_v15 }
 0x143   : > { %881 = vst.msk [vmem:[%s1405_s22 + $0x3c] sm:$0xf] %vm865_vm3, %v1121_v16  ;;  %897 = vst.msk [vmem:[%s1405_s22 + $0x7c] sm:$0xf] %vm865_vm3, %v1137_v17 }
 0x144 PF: > { %s13_s14 = sadd.s32 1, %s1264_s14   ;;  %s1512_s12 = smov %s1260_s13 }
 0x145   : > { %p10_p5 = scmp.ge.s32.totalorder %s13_s14, 10   ;;  %s1513_s13 = smov %s1515_s15 }
 0x147   :  { %12 = sbr.rel (!%p10_p5) target bundleno = 2 (0x2), region = 68 }

</bundles_post_ra>
